<compile_context>
chip_gen: v5e
topology: v5e:2x2
jax: 0.10.0
libtpu: 0.0.40
codegen_flags: <defaults>
</compile_context>

<pallas_src>
import math
import functools

import jax
import jax.numpy as jnp
from jax import lax
from jax.experimental import pallas as pl
from jax.experimental.pallas import tpu as pltpu


def _round_up(x, m):
    return ((x + m - 1) // m) * m


def _vmem_capacity_bytes():
    try:
        return int(pltpu.get_tpu_info().vmem_capacity_bytes)
    except Exception:
        return 64 * 1024 * 1024  # conservative default (v7x per-TC VMEM)


# ----------------------------------------------------------------------------
# Path A: embedding table resident in VMEM, in-VMEM row gather (no manual DMA).
# ----------------------------------------------------------------------------
def _resident_kernel(tok_ref,            # SMEM: flat token ids   (scalar prefetch)
                     emb_ref,            # VMEM: (vocab, E)  resident across the grid
                     pe_ref,             # VMEM: (block_len, 1, E)
                     out_ref,            # VMEM: (block_len, batch, E)
                     *, block_len, batch, scale):
    base = pl.program_id(0) * block_len * batch

    def gather(l, carry):
        for b in range(batch):                       # static unroll over batch
            tok = tok_ref[base + l * batch + b]
            out_ref[pl.ds(l, 1), b, :] = emb_ref[pl.ds(tok, 1), :]
        return carry

    lax.fori_loop(0, block_len, gather, 0, unroll=8)
    # One lane-dense fused scale + PE add over the whole block.
    out_ref[...] = (out_ref[...] * scale + pe_ref[...]).astype(out_ref.dtype)


# ----------------------------------------------------------------------------
# Path B: table stays in HBM; per-row DMA gather, double-buffered across blocks,
#         one aggregate wait per block.
# ----------------------------------------------------------------------------
def _hbm_gather_kernel(tok_ref,          # SMEM: flat token ids   (scalar prefetch)
                       emb_hbm,          # HBM:  (vocab, E)
                       pe_ref,           # VMEM: (block_len, 1, E)
                       out_ref,          # VMEM: (block_len, batch, E)
                       rows_buf,         # VMEM scratch: (2, block_len, batch, E)
                       sem,              # DMA sems: (2,)
                       *, block_len, batch, scale):
    i = pl.program_id(0)
    nb = pl.num_programs(0)

    def issue_block(block_idx, slot):
        base = block_idx * block_len * batch

        def body(l, carry):
            for b in range(batch):                   # static unroll over batch
                tok = tok_ref[base + l * batch + b]
                pltpu.make_async_copy(emb_hbm.at[tok],
                                      rows_buf.at[slot, l, b],
                                      sem.at[slot]).start()
            return carry

        lax.fori_loop(0, block_len, body, 0, unroll=8)

    # Prime the pipeline with block 0 on the very first grid step.
    @pl.when(i == 0)
    def _():
        issue_block(0, 0)

    slot = i % 2

    # Prefetch the next block's rows into the other slot before draining this one.
    @pl.when(i + 1 < nb)
    def _():
        issue_block(i + 1, 1 - slot)

    # Single aggregate wait: this descriptor's byte count equals the sum of all
    # row copies signaled on sem[slot] for the current block.
    pltpu.make_async_copy(rows_buf.at[slot], rows_buf.at[slot], sem.at[slot]).wait()

    out_ref[...] = (rows_buf[slot] * scale + pe_ref[...]).astype(out_ref.dtype)


# ----------------------------------------------------------------------------
# Wrapper: fused TokenEmbedding + PositionalEncoding (inference).
# ----------------------------------------------------------------------------
def embed_and_encode(tokens, emb_table, pe_table, *, block_len=None,
                     force_hbm_gather=False):
    """tokens [len, batch] int, emb_table [vocab, d_model], pe_table [>=len, d_model]
    returns [len, batch, d_model] = emb_table[tokens]*sqrt(d_model) + pe[:len, None, :]."""
    seq_len, batch = tokens.shape
    vocab, emb_size = emb_table.shape
    assert pe_table.shape[1] == emb_size, "pe_table d_model mismatch"
    assert pe_table.shape[0] >= seq_len, "pe_table must cover the sequence"

    dtype = emb_table.dtype
    itemsize = jnp.dtype(dtype).itemsize
    e_pad = _round_up(emb_size, 128)                # lane-dense output columns
    scale = float(math.sqrt(emb_size))              # sqrt of the ORIGINAL d_model

    # ------ path selection (generation-specific VMEM budget) ----------------
    vmem_cap = _vmem_capacity_bytes()
    table_bytes = _round_up(vocab, 8) * e_pad * itemsize
    use_resident = (not force_hbm_gather) and \
        (2 * table_bytes + (16 << 20) <= vmem_cap - (8 << 20))

    # ------ block length over the sequence axis -----------------------------
    if block_len is None:
        target_rows = 2048 if use_resident else 512     # gathered rows per grid step
        bl = max(8, ((target_rows // max(batch, 1)) // 8) * 8)
        bl = min(bl, _round_up(seq_len, 8))
        per_len_bytes = _round_up(max(batch, 8), 8) * e_pad * itemsize
        bl = min(bl, max(8, (((4 << 20) // per_len_bytes) // 8) * 8))  # <=4MiB/out block
        block_len = bl
    assert block_len % 8 == 0, "block_len must be a multiple of 8"
    len_pad = _round_up(seq_len, block_len)
    n_blocks = len_pad // block_len

    # ------ operand preparation ---------------------------------------------
    tok = jnp.clip(tokens.astype(jnp.int32), 0, vocab - 1)     # never OOB
    tok = jnp.pad(tok, ((0, len_pad - seq_len), (0, 0)))
    tok_flat = tok.reshape(-1)                                  # -> SMEM (prefetch)

    emb = emb_table
    pe = pe_table[:seq_len].astype(dtype)
    if e_pad != emb_size:
        emb = jnp.pad(emb, ((0, 0), (0, e_pad - emb_size)))
        pe = jnp.pad(pe, ((0, 0), (0, e_pad - emb_size)))
    if len_pad != seq_len:
        pe = jnp.pad(pe, ((0, len_pad - seq_len), (0, 0)))
    pe3 = pe.reshape(len_pad, 1, e_pad)            # broadcast over batch in-kernel

    # ------ VMEM accounting for the compiler limit --------------------------
    out_block_bytes = block_len * _round_up(max(batch, 8), 8) * e_pad * itemsize
    pe_block_bytes = block_len * 8 * e_pad * itemsize
    pipeline_bytes = 2 * (out_block_bytes + pe_block_bytes)     # double-buffered
    if use_resident:
        need = 2 * table_bytes + pipeline_bytes
    else:
        need = pipeline_bytes + 2 * out_block_bytes             # rows_buf scratch
    vmem_limit = int(min(vmem_cap - (2 << 20), max(32 << 20, need + (4 << 20))))

    out_shape = jax.ShapeDtypeStruct((len_pad, batch, e_pad), dtype)
    pe_spec = pl.BlockSpec((block_len, 1, e_pad), lambda i, tok: (i, 0, 0))
    out_spec = pl.BlockSpec((block_len, batch, e_pad), lambda i, tok: (i, 0, 0))

    if use_resident:
        kernel = functools.partial(_resident_kernel, block_len=block_len,
                                   batch=batch, scale=scale)
        grid_spec = pltpu.PrefetchScalarGridSpec(
            num_scalar_prefetch=1,
            grid=(n_blocks,),
            in_specs=[pl.BlockSpec((vocab, e_pad), lambda i, tok: (0, 0)),  # resident
                      pe_spec],
            out_specs=out_spec,
        )
        dim_sem = ("parallel",)           # no cross-iteration state -> megacore OK
    else:
        kernel = functools.partial(_hbm_gather_kernel, block_len=block_len,
                                   batch=batch, scale=scale)
        grid_spec = pltpu.PrefetchScalarGridSpec(
            num_scalar_prefetch=1,
            grid=(n_blocks,),
            in_specs=[pl.BlockSpec(memory_space=pl.ANY),    # table stays in HBM
                      pe_spec],
            out_specs=out_spec,
            scratch_shapes=[
                pltpu.VMEM((2, block_len, batch, e_pad), dtype),
                pltpu.SemaphoreType.DMA((2,)),
            ],
        )
        dim_sem = ("arbitrary",)          # cross-block DMA double-buffering is stateful

    out = pl.pallas_call(
        kernel,
        out_shape=out_shape,
        grid_spec=grid_spec,
        compiler_params=pltpu.CompilerParams(
            dimension_semantics=dim_sem,
            vmem_limit_bytes=vmem_limit),
    )(tok_flat, emb, pe3)

    return out[:seq_len, :, :emb_size]


def sinusoidal_positional_encoding(max_len, d_model):
    """Same formula as the PyTorch PositionalEncoding buffer (pe[:, 0])."""
    position = jnp.arange(max_len, dtype=jnp.float32)[:, None]
    div_term = jnp.exp(jnp.arange(0, d_model, 2, dtype=jnp.float32)
                       * (-math.log(10000.0) / d_model))
    pe = jnp.zeros((max_len, d_model), jnp.float32)
    pe = pe.at[:, 0::2].set(jnp.sin(position * div_term))
    pe = pe.at[:, 1::2].set(jnp.cos(position * div_term))
    return pe


if __name__ == "__main__":
    key = jax.random.PRNGKey(0)
    k_emb, k_tok, k_emb2, k_tok2 = jax.random.split(key, 4)

    # Case 1: small module-like shapes; table is VMEM-resident (fast path).
    vocab, d_model, seq_len, batch = 512, 128, 8, 2
    emb_table = jax.random.normal(k_emb, (vocab, d_model), jnp.float32)
    tokens = jax.random.randint(k_tok, (seq_len, batch), 0, vocab, dtype=jnp.int32)
    pe_table = sinusoidal_positional_encoding(64, d_model)

    out = jax.block_until_ready(embed_and_encode(tokens, emb_table, pe_table))
    ref = emb_table[tokens] * math.sqrt(d_model) + pe_table[:seq_len][:, None, :]
    assert out.shape == (seq_len, batch, d_model)
    assert jnp.allclose(out, ref, atol=1e-5, rtol=1e-5)

    # Case 2: multi-block grid + sequence padding on the resident fast path.
    vocab2, seq2, batch2 = 1000, 96, 4
    emb_table2 = jax.random.normal(k_emb2, (vocab2, d_model), jnp.float32)
    tokens2 = jax.random.randint(k_tok2, (seq2, batch2), 0, vocab2, dtype=jnp.int32)
    pe_table2 = sinusoidal_positional_encoding(128, d_model)
    ref2 = emb_table2[tokens2] * math.sqrt(d_model) + pe_table2[:seq2][:, None, :]

    out2 = jax.block_until_ready(
        embed_and_encode(tokens2, emb_table2, pe_table2, block_len=40))
    assert out2.shape == (seq2, batch2, d_model)
    assert jnp.allclose(out2, ref2, atol=1e-5, rtol=1e-5)

    # Case 3: force the large-vocabulary HBM row-gather path (cross-block
    # double-buffered DMAs + one aggregate wait per block).
    out3 = jax.block_until_ready(
        embed_and_encode(tokens2, emb_table2, pe_table2, block_len=40,
                         force_hbm_gather=True))
    assert out3.shape == (seq2, batch2, d_model)
    assert jnp.allclose(out3, ref2, atol=1e-5, rtol=1e-5)

    print("KERNEL_OK")
</pallas_src>

<mosaic_0001>
module attributes {stable_mosaic.version = 11 : i64} {
  func.func @_resident_kernel(%arg0: i32, %arg1: memref<16xi32, #tpu.memory_space<smem>>, %arg2: memref<512x128xf32, #tpu.memory_space<vmem>>, %arg3: memref<8x1x128xf32, #tpu.memory_space<vmem>>, %arg4: memref<8x2x128xf32, #tpu.memory_space<vmem>>) attributes {dimension_semantics = [#tpu.dimension_semantics<parallel>], iteration_bounds = array<i64: 1>, scalar_prefetch = 1 : i64, scratch_operands = 0 : i64, tpu.core_type = #tpu.core_type<tc>, window_params = [{pipeline_mode = #tpu.pipeline_mode<synchronous>, transform_indices = @transform_0, window_bounds = array<i64: 512, 128>}, {transform_indices = @transform_1, window_bounds = array<i64: 8, 1, 128>}, {transform_indices = @transform_2, window_bounds = array<i64: 8, 2, 128>}]} {
    %c8_i32 = arith.constant 8 : i32
    %0 = arith.muli %arg0, %c8_i32 : i32
    %c2_i32 = arith.constant 2 : i32
    %1 = arith.muli %0, %c2_i32 : i32
    %c0_i32 = arith.constant 0 : i32
    %c2_i32_0 = arith.constant 2 : i32
    %2 = arith.muli %c0_i32, %c2_i32_0 : i32
    %3 = arith.addi %1, %2 : i32
    %c0_i32_1 = arith.constant 0 : i32
    %4 = arith.addi %3, %c0_i32_1 : i32
    %5 = arith.index_cast %4 : i32 to index
    %6 = memref.load %arg1[%5] : memref<16xi32, #tpu.memory_space<smem>>
    %7 = arith.index_cast %6 : i32 to index
    %c0 = arith.constant 0 : index
    %8 = vector.load %arg2[%7, %c0] : memref<512x128xf32, #tpu.memory_space<vmem>>, vector<1x128xf32>
    %9 = arith.index_cast %c0_i32 : i32 to index
    %c0_2 = arith.constant 0 : index
    %c0_3 = arith.constant 0 : index
    %10 = vector.load %arg4[%9, %c0_2, %c0_3] : memref<8x2x128xf32, #tpu.memory_space<vmem>>, vector<1x1x128xf32>
    %11 = vector.shape_cast %10 : vector<1x1x128xf32> to vector<1x128xf32>
    %12 = vector.shape_cast %8 : vector<1x128xf32> to vector<1x1x128xf32>
    tpu.vector_store %arg4[%9, %c0_2, %c0_3], %12 {strides = array<i32>} : memref<8x2x128xf32, #tpu.memory_space<vmem>>, vector<1x1x128xf32>,
    %c2_i32_4 = arith.constant 2 : i32
    %13 = arith.muli %c0_i32, %c2_i32_4 : i32
    %14 = arith.addi %1, %13 : i32
    %c1_i32 = arith.constant 1 : i32
    %15 = arith.addi %14, %c1_i32 : i32
    %16 = arith.index_cast %15 : i32 to index
    %17 = memref.load %arg1[%16] : memref<16xi32, #tpu.memory_space<smem>>
    %18 = arith.index_cast %17 : i32 to index
    %c0_5 = arith.constant 0 : index
    %19 = vector.load %arg2[%18, %c0_5] : memref<512x128xf32, #tpu.memory_space<vmem>>, vector<1x128xf32>
    %20 = arith.index_cast %c0_i32 : i32 to index
    %c1 = arith.constant 1 : index
    %c0_6 = arith.constant 0 : index
    %21 = vector.load %arg4[%20, %c1, %c0_6] : memref<8x2x128xf32, #tpu.memory_space<vmem>>, vector<1x1x128xf32>
    %22 = vector.shape_cast %21 : vector<1x1x128xf32> to vector<1x128xf32>
    %23 = vector.shape_cast %19 : vector<1x128xf32> to vector<1x1x128xf32>
    tpu.vector_store %arg4[%20, %c1, %c0_6], %23 {strides = array<i32>} : memref<8x2x128xf32, #tpu.memory_space<vmem>>, vector<1x1x128xf32>,
    %c1_i32_7 = arith.constant 1 : i32
    %c2_i32_8 = arith.constant 2 : i32
    %24 = arith.muli %c1_i32_7, %c2_i32_8 : i32
    %25 = arith.addi %1, %24 : i32
    %c0_i32_9 = arith.constant 0 : i32
    %26 = arith.addi %25, %c0_i32_9 : i32
    %27 = arith.index_cast %26 : i32 to index
    %28 = memref.load %arg1[%27] : memref<16xi32, #tpu.memory_space<smem>>
    %29 = arith.index_cast %28 : i32 to index
    %c0_10 = arith.constant 0 : index
    %30 = vector.load %arg2[%29, %c0_10] : memref<512x128xf32, #tpu.memory_space<vmem>>, vector<1x128xf32>
    %31 = arith.index_cast %c1_i32_7 : i32 to index
    %c0_11 = arith.constant 0 : index
    %c0_12 = arith.constant 0 : index
    %32 = vector.load %arg4[%31, %c0_11, %c0_12] : memref<8x2x128xf32, #tpu.memory_space<vmem>>, vector<1x1x128xf32>
    %33 = vector.shape_cast %32 : vector<1x1x128xf32> to vector<1x128xf32>
    %34 = vector.shape_cast %30 : vector<1x128xf32> to vector<1x1x128xf32>
    tpu.vector_store %arg4[%31, %c0_11, %c0_12], %34 {strides = array<i32>} : memref<8x2x128xf32, #tpu.memory_space<vmem>>, vector<1x1x128xf32>,
    %c2_i32_13 = arith.constant 2 : i32
    %35 = arith.muli %c1_i32_7, %c2_i32_13 : i32
    %36 = arith.addi %1, %35 : i32
    %c1_i32_14 = arith.constant 1 : i32
    %37 = arith.addi %36, %c1_i32_14 : i32
    %38 = arith.index_cast %37 : i32 to index
    %39 = memref.load %arg1[%38] : memref<16xi32, #tpu.memory_space<smem>>
    %40 = arith.index_cast %39 : i32 to index
    %c0_15 = arith.constant 0 : index
    %41 = vector.load %arg2[%40, %c0_15] : memref<512x128xf32, #tpu.memory_space<vmem>>, vector<1x128xf32>
    %42 = arith.index_cast %c1_i32_7 : i32 to index
    %c1_16 = arith.constant 1 : index
    %c0_17 = arith.constant 0 : index
    %43 = vector.load %arg4[%42, %c1_16, %c0_17] : memref<8x2x128xf32, #tpu.memory_space<vmem>>, vector<1x1x128xf32>
    %44 = vector.shape_cast %43 : vector<1x1x128xf32> to vector<1x128xf32>
    %45 = vector.shape_cast %41 : vector<1x128xf32> to vector<1x1x128xf32>
    tpu.vector_store %arg4[%42, %c1_16, %c0_17], %45 {strides = array<i32>} : memref<8x2x128xf32, #tpu.memory_space<vmem>>, vector<1x1x128xf32>,
    %c2_i32_18 = arith.constant 2 : i32
    %c2_i32_19 = arith.constant 2 : i32
    %46 = arith.muli %c2_i32_18, %c2_i32_19 : i32
    %47 = arith.addi %1, %46 : i32
    %c0_i32_20 = arith.constant 0 : i32
    %48 = arith.addi %47, %c0_i32_20 : i32
    %49 = arith.index_cast %48 : i32 to index
    %50 = memref.load %arg1[%49] : memref<16xi32, #tpu.memory_space<smem>>
    %51 = arith.index_cast %50 : i32 to index
    %c0_21 = arith.constant 0 : index
    %52 = vector.load %arg2[%51, %c0_21] : memref<512x128xf32, #tpu.memory_space<vmem>>, vector<1x128xf32>
    %53 = arith.index_cast %c2_i32_18 : i32 to index
    %c0_22 = arith.constant 0 : index
    %c0_23 = arith.constant 0 : index
    %54 = vector.load %arg4[%53, %c0_22, %c0_23] : memref<8x2x128xf32, #tpu.memory_space<vmem>>, vector<1x1x128xf32>
    %55 = vector.shape_cast %54 : vector<1x1x128xf32> to vector<1x128xf32>
    %56 = vector.shape_cast %52 : vector<1x128xf32> to vector<1x1x128xf32>
    tpu.vector_store %arg4[%53, %c0_22, %c0_23], %56 {strides = array<i32>} : memref<8x2x128xf32, #tpu.memory_space<vmem>>, vector<1x1x128xf32>,
    %c2_i32_24 = arith.constant 2 : i32
    %57 = arith.muli %c2_i32_18, %c2_i32_24 : i32
    %58 = arith.addi %1, %57 : i32
    %c1_i32_25 = arith.constant 1 : i32
    %59 = arith.addi %58, %c1_i32_25 : i32
    %60 = arith.index_cast %59 : i32 to index
    %61 = memref.load %arg1[%60] : memref<16xi32, #tpu.memory_space<smem>>
    %62 = arith.index_cast %61 : i32 to index
    %c0_26 = arith.constant 0 : index
    %63 = vector.load %arg2[%62, %c0_26] : memref<512x128xf32, #tpu.memory_space<vmem>>, vector<1x128xf32>
    %64 = arith.index_cast %c2_i32_18 : i32 to index
    %c1_27 = arith.constant 1 : index
    %c0_28 = arith.constant 0 : index
    %65 = vector.load %arg4[%64, %c1_27, %c0_28] : memref<8x2x128xf32, #tpu.memory_space<vmem>>, vector<1x1x128xf32>
    %66 = vector.shape_cast %65 : vector<1x1x128xf32> to vector<1x128xf32>
    %67 = vector.shape_cast %63 : vector<1x128xf32> to vector<1x1x128xf32>
    tpu.vector_store %arg4[%64, %c1_27, %c0_28], %67 {strides = array<i32>} : memref<8x2x128xf32, #tpu.memory_space<vmem>>, vector<1x1x128xf32>,
    %c3_i32 = arith.constant 3 : i32
    %c2_i32_29 = arith.constant 2 : i32
    %68 = arith.muli %c3_i32, %c2_i32_29 : i32
    %69 = arith.addi %1, %68 : i32
    %c0_i32_30 = arith.constant 0 : i32
    %70 = arith.addi %69, %c0_i32_30 : i32
    %71 = arith.index_cast %70 : i32 to index
    %72 = memref.load %arg1[%71] : memref<16xi32, #tpu.memory_space<smem>>
    %73 = arith.index_cast %72 : i32 to index
    %c0_31 = arith.constant 0 : index
    %74 = vector.load %arg2[%73, %c0_31] : memref<512x128xf32, #tpu.memory_space<vmem>>, vector<1x128xf32>
    %75 = arith.index_cast %c3_i32 : i32 to index
    %c0_32 = arith.constant 0 : index
    %c0_33 = arith.constant 0 : index
    %76 = vector.load %arg4[%75, %c0_32, %c0_33] : memref<8x2x128xf32, #tpu.memory_space<vmem>>, vector<1x1x128xf32>
    %77 = vector.shape_cast %76 : vector<1x1x128xf32> to vector<1x128xf32>
    %78 = vector.shape_cast %74 : vector<1x128xf32> to vector<1x1x128xf32>
    tpu.vector_store %arg4[%75, %c0_32, %c0_33], %78 {strides = array<i32>} : memref<8x2x128xf32, #tpu.memory_space<vmem>>, vector<1x1x128xf32>,
    %c2_i32_34 = arith.constant 2 : i32
    %79 = arith.muli %c3_i32, %c2_i32_34 : i32
    %80 = arith.addi %1, %79 : i32
    %c1_i32_35 = arith.constant 1 : i32
    %81 = arith.addi %80, %c1_i32_35 : i32
    %82 = arith.index_cast %81 : i32 to index
    %83 = memref.load %arg1[%82] : memref<16xi32, #tpu.memory_space<smem>>
    %84 = arith.index_cast %83 : i32 to index
    %c0_36 = arith.constant 0 : index
    %85 = vector.load %arg2[%84, %c0_36] : memref<512x128xf32, #tpu.memory_space<vmem>>, vector<1x128xf32>
    %86 = arith.index_cast %c3_i32 : i32 to index
    %c1_37 = arith.constant 1 : index
    %c0_38 = arith.constant 0 : index
    %87 = vector.load %arg4[%86, %c1_37, %c0_38] : memref<8x2x128xf32, #tpu.memory_space<vmem>>, vector<1x1x128xf32>
    %88 = vector.shape_cast %87 : vector<1x1x128xf32> to vector<1x128xf32>
    %89 = vector.shape_cast %85 : vector<1x128xf32> to vector<1x1x128xf32>
    tpu.vector_store %arg4[%86, %c1_37, %c0_38], %89 {strides = array<i32>} : memref<8x2x128xf32, #tpu.memory_space<vmem>>, vector<1x1x128xf32>,
    %c4_i32 = arith.constant 4 : i32
    %c2_i32_39 = arith.constant 2 : i32
    %90 = arith.muli %c4_i32, %c2_i32_39 : i32
    %91 = arith.addi %1, %90 : i32
    %c0_i32_40 = arith.constant 0 : i32
    %92 = arith.addi %91, %c0_i32_40 : i32
    %93 = arith.index_cast %92 : i32 to index
    %94 = memref.load %arg1[%93] : memref<16xi32, #tpu.memory_space<smem>>
    %95 = arith.index_cast %94 : i32 to index
    %c0_41 = arith.constant 0 : index
    %96 = vector.load %arg2[%95, %c0_41] : memref<512x128xf32, #tpu.memory_space<vmem>>, vector<1x128xf32>
    %97 = arith.index_cast %c4_i32 : i32 to index
    %c0_42 = arith.constant 0 : index
    %c0_43 = arith.constant 0 : index
    %98 = vector.load %arg4[%97, %c0_42, %c0_43] : memref<8x2x128xf32, #tpu.memory_space<vmem>>, vector<1x1x128xf32>
    %99 = vector.shape_cast %98 : vector<1x1x128xf32> to vector<1x128xf32>
    %100 = vector.shape_cast %96 : vector<1x128xf32> to vector<1x1x128xf32>
    tpu.vector_store %arg4[%97, %c0_42, %c0_43], %100 {strides = array<i32>} : memref<8x2x128xf32, #tpu.memory_space<vmem>>, vector<1x1x128xf32>,
    %c2_i32_44 = arith.constant 2 : i32
    %101 = arith.muli %c4_i32, %c2_i32_44 : i32
    %102 = arith.addi %1, %101 : i32
    %c1_i32_45 = arith.constant 1 : i32
    %103 = arith.addi %102, %c1_i32_45 : i32
    %104 = arith.index_cast %103 : i32 to index
    %105 = memref.load %arg1[%104] : memref<16xi32, #tpu.memory_space<smem>>
    %106 = arith.index_cast %105 : i32 to index
    %c0_46 = arith.constant 0 : index
    %107 = vector.load %arg2[%106, %c0_46] : memref<512x128xf32, #tpu.memory_space<vmem>>, vector<1x128xf32>
    %108 = arith.index_cast %c4_i32 : i32 to index
    %c1_47 = arith.constant 1 : index
    %c0_48 = arith.constant 0 : index
    %109 = vector.load %arg4[%108, %c1_47, %c0_48] : memref<8x2x128xf32, #tpu.memory_space<vmem>>, vector<1x1x128xf32>
    %110 = vector.shape_cast %109 : vector<1x1x128xf32> to vector<1x128xf32>
    %111 = vector.shape_cast %107 : vector<1x128xf32> to vector<1x1x128xf32>
    tpu.vector_store %arg4[%108, %c1_47, %c0_48], %111 {strides = array<i32>} : memref<8x2x128xf32, #tpu.memory_space<vmem>>, vector<1x1x128xf32>,
    %c5_i32 = arith.constant 5 : i32
    %c2_i32_49 = arith.constant 2 : i32
    %112 = arith.muli %c5_i32, %c2_i32_49 : i32
    %113 = arith.addi %1, %112 : i32
    %c0_i32_50 = arith.constant 0 : i32
    %114 = arith.addi %113, %c0_i32_50 : i32
    %115 = arith.index_cast %114 : i32 to index
    %116 = memref.load %arg1[%115] : memref<16xi32, #tpu.memory_space<smem>>
    %117 = arith.index_cast %116 : i32 to index
    %c0_51 = arith.constant 0 : index
    %118 = vector.load %arg2[%117, %c0_51] : memref<512x128xf32, #tpu.memory_space<vmem>>, vector<1x128xf32>
    %119 = arith.index_cast %c5_i32 : i32 to index
    %c0_52 = arith.constant 0 : index
    %c0_53 = arith.constant 0 : index
    %120 = vector.load %arg4[%119, %c0_52, %c0_53] : memref<8x2x128xf32, #tpu.memory_space<vmem>>, vector<1x1x128xf32>
    %121 = vector.shape_cast %120 : vector<1x1x128xf32> to vector<1x128xf32>
    %122 = vector.shape_cast %118 : vector<1x128xf32> to vector<1x1x128xf32>
    tpu.vector_store %arg4[%119, %c0_52, %c0_53], %122 {strides = array<i32>} : memref<8x2x128xf32, #tpu.memory_space<vmem>>, vector<1x1x128xf32>,
    %c2_i32_54 = arith.constant 2 : i32
    %123 = arith.muli %c5_i32, %c2_i32_54 : i32
    %124 = arith.addi %1, %123 : i32
    %c1_i32_55 = arith.constant 1 : i32
    %125 = arith.addi %124, %c1_i32_55 : i32
    %126 = arith.index_cast %125 : i32 to index
    %127 = memref.load %arg1[%126] : memref<16xi32, #tpu.memory_space<smem>>
    %128 = arith.index_cast %127 : i32 to index
    %c0_56 = arith.constant 0 : index
    %129 = vector.load %arg2[%128, %c0_56] : memref<512x128xf32, #tpu.memory_space<vmem>>, vector<1x128xf32>
    %130 = arith.index_cast %c5_i32 : i32 to index
    %c1_57 = arith.constant 1 : index
    %c0_58 = arith.constant 0 : index
    %131 = vector.load %arg4[%130, %c1_57, %c0_58] : memref<8x2x128xf32, #tpu.memory_space<vmem>>, vector<1x1x128xf32>
    %132 = vector.shape_cast %131 : vector<1x1x128xf32> to vector<1x128xf32>
    %133 = vector.shape_cast %129 : vector<1x128xf32> to vector<1x1x128xf32>
    tpu.vector_store %arg4[%130, %c1_57, %c0_58], %133 {strides = array<i32>} : memref<8x2x128xf32, #tpu.memory_space<vmem>>, vector<1x1x128xf32>,
    %c6_i32 = arith.constant 6 : i32
    %c2_i32_59 = arith.constant 2 : i32
    %134 = arith.muli %c6_i32, %c2_i32_59 : i32
    %135 = arith.addi %1, %134 : i32
    %c0_i32_60 = arith.constant 0 : i32
    %136 = arith.addi %135, %c0_i32_60 : i32
    %137 = arith.index_cast %136 : i32 to index
    %138 = memref.load %arg1[%137] : memref<16xi32, #tpu.memory_space<smem>>
    %139 = arith.index_cast %138 : i32 to index
    %c0_61 = arith.constant 0 : index
    %140 = vector.load %arg2[%139, %c0_61] : memref<512x128xf32, #tpu.memory_space<vmem>>, vector<1x128xf32>
    %141 = arith.index_cast %c6_i32 : i32 to index
    %c0_62 = arith.constant 0 : index
    %c0_63 = arith.constant 0 : index
    %142 = vector.load %arg4[%141, %c0_62, %c0_63] : memref<8x2x128xf32, #tpu.memory_space<vmem>>, vector<1x1x128xf32>
    %143 = vector.shape_cast %142 : vector<1x1x128xf32> to vector<1x128xf32>
    %144 = vector.shape_cast %140 : vector<1x128xf32> to vector<1x1x128xf32>
    tpu.vector_store %arg4[%141, %c0_62, %c0_63], %144 {strides = array<i32>} : memref<8x2x128xf32, #tpu.memory_space<vmem>>, vector<1x1x128xf32>,
    %c2_i32_64 = arith.constant 2 : i32
    %145 = arith.muli %c6_i32, %c2_i32_64 : i32
    %146 = arith.addi %1, %145 : i32
    %c1_i32_65 = arith.constant 1 : i32
    %147 = arith.addi %146, %c1_i32_65 : i32
    %148 = arith.index_cast %147 : i32 to index
    %149 = memref.load %arg1[%148] : memref<16xi32, #tpu.memory_space<smem>>
    %150 = arith.index_cast %149 : i32 to index
    %c0_66 = arith.constant 0 : index
    %151 = vector.load %arg2[%150, %c0_66] : memref<512x128xf32, #tpu.memory_space<vmem>>, vector<1x128xf32>
    %152 = arith.index_cast %c6_i32 : i32 to index
    %c1_67 = arith.constant 1 : index
    %c0_68 = arith.constant 0 : index
    %153 = vector.load %arg4[%152, %c1_67, %c0_68] : memref<8x2x128xf32, #tpu.memory_space<vmem>>, vector<1x1x128xf32>
    %154 = vector.shape_cast %153 : vector<1x1x128xf32> to vector<1x128xf32>
    %155 = vector.shape_cast %151 : vector<1x128xf32> to vector<1x1x128xf32>
    tpu.vector_store %arg4[%152, %c1_67, %c0_68], %155 {strides = array<i32>} : memref<8x2x128xf32, #tpu.memory_space<vmem>>, vector<1x1x128xf32>,
    %c7_i32 = arith.constant 7 : i32
    %c2_i32_69 = arith.constant 2 : i32
    %156 = arith.muli %c7_i32, %c2_i32_69 : i32
    %157 = arith.addi %1, %156 : i32
    %c0_i32_70 = arith.constant 0 : i32
    %158 = arith.addi %157, %c0_i32_70 : i32
    %159 = arith.index_cast %158 : i32 to index
    %160 = memref.load %arg1[%159] : memref<16xi32, #tpu.memory_space<smem>>
    %161 = arith.index_cast %160 : i32 to index
    %c0_71 = arith.constant 0 : index
    %162 = vector.load %arg2[%161, %c0_71] : memref<512x128xf32, #tpu.memory_space<vmem>>, vector<1x128xf32>
    %163 = arith.index_cast %c7_i32 : i32 to index
    %c0_72 = arith.constant 0 : index
    %c0_73 = arith.constant 0 : index
    %164 = vector.load %arg4[%163, %c0_72, %c0_73] : memref<8x2x128xf32, #tpu.memory_space<vmem>>, vector<1x1x128xf32>
    %165 = vector.shape_cast %164 : vector<1x1x128xf32> to vector<1x128xf32>
    %166 = vector.shape_cast %162 : vector<1x128xf32> to vector<1x1x128xf32>
    tpu.vector_store %arg4[%163, %c0_72, %c0_73], %166 {strides = array<i32>} : memref<8x2x128xf32, #tpu.memory_space<vmem>>, vector<1x1x128xf32>,
    %c2_i32_74 = arith.constant 2 : i32
    %167 = arith.muli %c7_i32, %c2_i32_74 : i32
    %168 = arith.addi %1, %167 : i32
    %c1_i32_75 = arith.constant 1 : i32
    %169 = arith.addi %168, %c1_i32_75 : i32
    %170 = arith.index_cast %169 : i32 to index
    %171 = memref.load %arg1[%170] : memref<16xi32, #tpu.memory_space<smem>>
    %172 = arith.index_cast %171 : i32 to index
    %c0_76 = arith.constant 0 : index
    %173 = vector.load %arg2[%172, %c0_76] : memref<512x128xf32, #tpu.memory_space<vmem>>, vector<1x128xf32>
    %174 = arith.index_cast %c7_i32 : i32 to index
    %c1_77 = arith.constant 1 : index
    %c0_78 = arith.constant 0 : index
    %175 = vector.load %arg4[%174, %c1_77, %c0_78] : memref<8x2x128xf32, #tpu.memory_space<vmem>>, vector<1x1x128xf32>
    %176 = vector.shape_cast %175 : vector<1x1x128xf32> to vector<1x128xf32>
    %177 = vector.shape_cast %173 : vector<1x128xf32> to vector<1x1x128xf32>
    tpu.vector_store %arg4[%174, %c1_77, %c0_78], %177 {strides = array<i32>} : memref<8x2x128xf32, #tpu.memory_space<vmem>>, vector<1x1x128xf32>,
    %c8_i32_79 = arith.constant 8 : i32
    %c0_80 = arith.constant 0 : index
    %c0_81 = arith.constant 0 : index
    %c0_82 = arith.constant 0 : index
    %178 = vector.load %arg4[%c0_80, %c0_81, %c0_82] : memref<8x2x128xf32, #tpu.memory_space<vmem>>, vector<8x2x128xf32>
    %cst = arith.constant 11.3137083 : f32
    %179 = vector.broadcast %cst : f32 to vector<8x2x128xf32>
    %180 = arith.mulf %178, %179 : vector<8x2x128xf32>
    %c0_83 = arith.constant 0 : index
    %c0_84 = arith.constant 0 : index
    %c0_85 = arith.constant 0 : index
    %181 = vector.load %arg3[%c0_83, %c0_84, %c0_85] : memref<8x1x128xf32, #tpu.memory_space<vmem>>, vector<8x1x128xf32>
    %182 = vector.broadcast %181 : vector<8x1x128xf32> to vector<8x2x128xf32>
    %183 = arith.addf %180, %182 : vector<8x2x128xf32>
    %c0_86 = arith.constant 0 : index
    %c0_87 = arith.constant 0 : index
    %c0_88 = arith.constant 0 : index
    %184 = vector.load %arg4[%c0_86, %c0_87, %c0_88] : memref<8x2x128xf32, #tpu.memory_space<vmem>>, vector<8x2x128xf32>
    tpu.vector_store %arg4[%c0_86, %c0_87, %c0_88], %183 {strides = array<i32>} : memref<8x2x128xf32, #tpu.memory_space<vmem>>, vector<8x2x128xf32>,
    return
  }
  func.func @transform_0(%arg0: i32, %arg1: memref<16xi32, #tpu.memory_space<smem>>) -> (i32, i32) {
    %c0_i32 = arith.constant 0 : i32
    %c0_i32_0 = arith.constant 0 : i32
    %c0_i32_1 = arith.constant 0 : i32
    return %c0_i32, %c0_i32_0 : i32, i32
  }
  func.func @transform_1(%arg0: i32, %arg1: memref<16xi32, #tpu.memory_space<smem>>) -> (i32, i32, i32) {
    %c0_i32 = arith.constant 0 : i32
    %c0_i32_0 = arith.constant 0 : i32
    %c0_i32_1 = arith.constant 0 : i32
    return %arg0, %c0_i32, %c0_i32_0 : i32, i32, i32
  }
  func.func @transform_2(%arg0: i32, %arg1: memref<16xi32, #tpu.memory_space<smem>>) -> (i32, i32, i32) {
    %c0_i32 = arith.constant 0 : i32
    %c0_i32_0 = arith.constant 0 : i32
    %c0_i32_1 = arith.constant 0 : i32
    return %arg0, %c0_i32, %c0_i32_0 : i32, i32, i32
  }
}

</mosaic_0001>

<bundles_post_ra>
// kernel: tpu_custom_call.1
= control target key start
LH: loop header
LB: loop body
LE: loop exit
PB: predicated region body
PF: predicated region fallthrough
CT: control target
= control target key end

     0   :  { %s365_s15 = smov [#allocation3]   ;;  %s417_s0 = inlined_call_operand.hbm [shape: s32[16], index: 0, kind: input, shape index: {}]   ;;  %s418_s1 = inlined_call_operand.hbm [shape: f32[512,128], index: 1, kind: input, shape index: {}]   ;;  %s419_s2 = inlined_call_operand.hbm [shape: f32[8,1,128], index: 2, kind: input, shape index: {}]   ;;  %s420_s3 = inlined_call_operand.hbm [shape: f32[8,2,128], index: 3, kind: output, shape index: {}]  }
   0x1   :  { %s9_s14 = sshll.u32 %s417_s0, 4  ;;  %s10_s14 = int_to_ptr.hbm [resolvable:$true] %s9_s14 }
   0x2   :  { %12 = dma.hbm_to_smem %s10_s14, 16, %s365_s15, [#allocation2] }
   0x3   :  { %357 = dma.done.wait [#allocation2], 16 }
   0x4   :  { %358 = vsyncadd [#allocation2], 4294967280 }
   0x5   :  { %15 = sfence }
   0x6   :  { %16 = vsyncpa [#allocation5], 0 }
   0x7   :  { %17 = vsyncpa [#allocation8], 0 }
   0x8   :  { %18 = vsyncpa [#allocation6], 0  ;;  %s23_s18 = sshll.u32 %s418_s1, 4  ;;  %s366_s19 = smov [#allocation4]   ;;  %s24_s18 = int_to_ptr.hbm [resolvable:$true] %s23_s18 }
   0x9   :  { %s25_s20 = sshll.u32 %s366_s19, 4  ;;  %s36_s0 = sshll.u32 %s419_s2, 4  ;;  %s26_s20 = int_to_ptr.vmem [resolvable:$true] %s25_s20  ;;  %s37_s0 = int_to_ptr.hbm [resolvable:$true] %s36_s0 }
   0xa   :  { %s367_s23 = smov 128   ;;  %s368_s24 = smov 8  }
   0xb   :  { %31 = dma.hbm_to_vmem [thread:$0]  %s24_s18, 8192, %s26_s20, [#allocation5], %s367_s23, %s367_s23, %s368_s24  }
   0xc   :  { %s369_s25 = smov [#allocation7]   ;;  %s370_s27 = smov 16  }
   0xd   :  { %s38_s26 = sshll.u32 %s369_s25, 4  ;;  %s371_s28 = smov 1   ;;  %s39_s26 = int_to_ptr.vmem [resolvable:$true] %s38_s26 }
   0xe   :  { %44 = dma.hbm_to_vmem [thread:$0]  %s37_s0, 128, %s39_s26, [#allocation8], %s370_s27, %s370_s27, %s371_s28  }
   0xf   :  { %359 = dma.done.wait [#allocation5], 8192  }
  0x10   :  { %360 = vsyncadd [#allocation5], 4294959104 }
  0x11   :  { %361 = dma.done.wait [#allocation8], 128  }
  0x12   :  { %362 = vsyncadd [#allocation8], 4294967168  ;;  %s54_s1 = sld [smem:[#allocation3]]  ;;  %v265_v11 = vld [vmem:[#allocation7] ss:$0 sm:$0xff] }
  0x13   :  { %s240_s29 = sld [smem:[#allocation3 + $0x1]]  ;;  %v266_v14 = vld [vmem:[#allocation7 + $0x1] ss:$0 sm:$0xff]  ;;  %v267_v19 = vld [vmem:[#allocation7 + $0x2] ss:$0 sm:$0xff] }
  0x14   :  { %s241_s30 = sld [smem:[#allocation3 + $0x2]]  ;;  %v268_v30 = vld [vmem:[#allocation7 + $0x3] ss:$0 sm:$0xff]  ;;  %v269_v34 = vld [vmem:[#allocation7 + $0x4] ss:$0 sm:$0xff] }
  0x15   :  { %s242_s4 = sld [smem:[#allocation3 + $0x3]]  ;;  %v270_v36 = vld [vmem:[#allocation7 + $0x5] ss:$0 sm:$0xff]  ;;  %v271_v41 = vld [vmem:[#allocation7 + $0x6] ss:$0 sm:$0xff] }
  0x16   :  { %s243_s5 = sld [smem:[#allocation3 + $0x4]]  ;;  %v272_v46 = vld [vmem:[#allocation7 + $0x7] ss:$0 sm:$0xff] }
  0x17   :  { %s244_s2 = sld [smem:[#allocation3 + $0x5]] }
  0x18   :  { %s245_s6 = sld [smem:[#allocation3 + $0x6]]  ;;  %s55_s7 = scalar_lea.vmem [#allocation4], %s54_s1 }
  0x19   :  { %v56_v0 = vld [vmem:[%s55_s7] sm:$0x1]  ;;  %s246_s8 = sld [smem:[#allocation3 + $0x7]]  ;;  %s60_s9 = scalar_lea.vmem [#allocation4], %s240_s29 }
  0x1a   :  { %57 = vst [vmem:[#allocation9] sm:$0x1] %v56_v0  ;;  %v61_v1 = vld [vmem:[%s60_s9] sm:$0x1]  ;;  %s65_s10 = scalar_lea.vmem [#allocation4], %s241_s30  ;;  %s247_s16 = sld [smem:[#allocation3 + $0x8]] }
  0x1b   :  { %62 = vst [vmem:[#allocation9 + $0x1] sm:$0x1] %v61_v1  ;;  %v66_v2 = vld [vmem:[%s65_s10] sm:$0x1]  ;;  %s71_s11 = scalar_lea.vmem [#allocation4], %s242_s4  ;;  %s248_s17 = sld [smem:[#allocation3 + $0x9]] }
  0x1c   :  { %68 = vst [vmem:[#allocation9 + $0x2] sm:$0x1] %v66_v2  ;;  %v72_v3 = vld [vmem:[%s71_s11] sm:$0x1]  ;;  %s76_s12 = scalar_lea.vmem [#allocation4], %s243_s5  ;;  %s249_s18 = sld [smem:[#allocation3 + $0xa]] }
  0x1d   :  { %73 = vst [vmem:[#allocation9 + $0x3] sm:$0x1] %v72_v3  ;;  %v77_v4 = vld [vmem:[%s76_s12] sm:$0x1]  ;;  %s82_s13 = scalar_lea.vmem [#allocation4], %s244_s2  ;;  %s250_s19 = sld [smem:[#allocation3 + $0xb]] }
  0x1e   :  { %79 = vst [vmem:[#allocation9 + $0x4] sm:$0x1] %v77_v4  ;;  %v83_v5 = vld [vmem:[%s82_s13] sm:$0x1]  ;;  %s87_s14 = scalar_lea.vmem [#allocation4], %s245_s6  ;;  %s251_s20 = sld [smem:[#allocation3 + $0xc]] }
  0x1f   :  { %84 = vst [vmem:[#allocation9 + $0x5] sm:$0x1] %v83_v5  ;;  %v88_v6 = vld [vmem:[%s87_s14] sm:$0x1]  ;;  %s93_s15 = scalar_lea.vmem [#allocation4], %s246_s8  ;;  %s252_s21 = sld [smem:[#allocation3 + $0xd]] }
  0x20   :  { %90 = vst [vmem:[#allocation9 + $0x6] sm:$0x1] %v88_v6  ;;  %v94_v7 = vld [vmem:[%s93_s15] sm:$0x1]  ;;  %s253_s22 = sld [smem:[#allocation3 + $0xe]]  ;;  %s98_s0 = scalar_lea.vmem [#allocation4], %s247_s16 }
  0x21   :  { %95 = vst [vmem:[#allocation9 + $0x7] sm:$0x1] %v94_v7  ;;  %v99_v13 = vld [vmem:[%s98_s0] sm:$0x1]  ;;  %s404_s23 = sld [smem:[#allocation3 + $0xf]]  ;;  %s104_s24 = scalar_lea.vmem [#allocation4], %s248_s17 }
  0x22   :  { %v140_v8 = vld [vmem:[#allocation9] sm:$0x3]  ;;  %101 = vst [vmem:[#allocation9 + $0x8] sm:$0x1] %v99_v13  ;;  %v105_v15 = vld [vmem:[%s104_s24] sm:$0x1] }
  0x23   :  { %v148_v10 = vmul.f32 11.313708, %v140_v8  ;;  %106 = vst [vmem:[#allocation9 + $0x9] sm:$0x1] %v105_v15  ;;  %s109_s25 = scalar_lea.vmem [#allocation4], %s249_s18  ;;  %s115_s26 = scalar_lea.vmem [#allocation4], %s250_s19 }
  0x24   :  { %v141_v9 = vld [vmem:[#allocation9 + $0x2] sm:$0x3]  ;;  %v110_v16 = vld [vmem:[%s109_s25] sm:$0x1]  ;;  %s120_s27 = scalar_lea.vmem [#allocation4], %s251_s20  ;;  %s210_s30 = sshll.u32 %s420_s3, 4  ;;  %s211_s30 = int_to_ptr.hbm [resolvable:$true] %s210_s30 }
  0x25   :  { %v149_v12 = vmul.f32 11.313708, %v141_v9  ;;  %112 = vst [vmem:[#allocation9 + $0xa] sm:$0x1] %v110_v16  ;;  %v116_v18 = vld [vmem:[%s115_s26] sm:$0x1]  ;;  %v188_v22 = vadd.f32 %v265_v11, %v148_v10 }
  0x26   :  { %v142_v17 = vld [vmem:[#allocation9 + $0x4] sm:$0x3]  ;;  %117 = vst [vmem:[#allocation9 + $0xb] sm:$0x1] %v116_v18  ;;  %v121_v20 = vld [vmem:[%s120_s27] sm:$0x1] }
  0x27   :  { %123 = vst [vmem:[#allocation9 + $0xc] sm:$0x1] %v121_v20  ;;  %s126_s28 = scalar_lea.vmem [#allocation4], %s252_s21  ;;  %s131_s4 = scalar_lea.vmem [#allocation4], %s253_s22  ;;  %v189_v24 = vadd.f32 %v266_v14, %v149_v12  ;;  %v150_v26 = vmul.f32 11.313708, %v142_v17 }
  0x28   :  { %v127_v21 = vld [vmem:[%s126_s28] sm:$0x1]  ;;  %s372_s5 = smov [#allocation9]   ;;  %s137_s6 = scalar_lea.vmem [#allocation4], %s404_s23  ;;  %v143_v27 = vld [vmem:[#allocation9 + $0x6] sm:$0x3] }
  0x29   :  { %128 = vst [vmem:[#allocation9 + $0xd] sm:$0x1] %v127_v21  ;;  %v132_v23 = vld [vmem:[%s131_s4] sm:$0x1]  ;;  %s409_s2 = sshll.u32 %s372_s5, 4  ;;  %v190_v28 = vadd.f32 %v267_v19, %v150_v26  ;;  %s373_s9 = smov 32   ;;  %s209_s2 = int_to_ptr.vmem [resolvable:$true] %s409_s2 }
  0x2a   :  { %134 = vst [vmem:[#allocation9 + $0xe] sm:$0x1] %v132_v23  ;;  %v138_v25 = vld [vmem:[%s137_s6] sm:$0x1]  ;;  %v151_v29 = vmul.f32 11.313708, %v143_v27 }
  0x2b   :  { %139 = vst [vmem:[#allocation9 + $0xf] sm:$0x1] %v138_v25  ;;  %v144_v31 = vld [vmem:[#allocation9 + $0x8] sm:$0x3]  ;;  %s374_s10 = smov 2  }
  0x2c   :  { %196 = vst [vmem:[#allocation9] sm:$0x3] %v188_v22  ;;  %v191_v32 = vadd.f32 %v268_v30, %v151_v29  ;;  %v152_v33 = vmul.f32 11.313708, %v144_v31 }
  0x2d   :  { %197 = vst [vmem:[#allocation9 + $0x2] sm:$0x3] %v189_v24  ;;  %v145_v35 = vld [vmem:[#allocation9 + $0xa] sm:$0x3] }
  0x2e   :  { %198 = vst [vmem:[#allocation9 + $0x4] sm:$0x3] %v190_v28  ;;  %v192_v37 = vadd.f32 %v269_v34, %v152_v33  ;;  %v153_v38 = vmul.f32 11.313708, %v145_v35 }
  0x2f   :  { %199 = vst [vmem:[#allocation9 + $0x6] sm:$0x3] %v191_v32 }
  0x30   :  { %v146_v39 = vld [vmem:[#allocation9 + $0xc] sm:$0x3]  ;;  %200 = vst [vmem:[#allocation9 + $0x8] sm:$0x3] %v192_v37  ;;  %v193_v42 = vadd.f32 %v270_v36, %v153_v38 }
  0x31   :  { %v154_v40 = vmul.f32 11.313708, %v146_v39 }
  0x32   :  { %v147_v43 = vld [vmem:[#allocation9 + $0xe] sm:$0x3]  ;;  %201 = vst [vmem:[#allocation9 + $0xa] sm:$0x3] %v193_v42 }
  0x33   :  { %v194_v44 = vadd.f32 %v271_v41, %v154_v40  ;;  %v155_v45 = vmul.f32 11.313708, %v147_v43 }
  0x35   :  { %202 = vst [vmem:[#allocation9 + $0xc] sm:$0x3] %v194_v44  ;;  %v195_v47 = vadd.f32 %v272_v46, %v155_v45 }
  0x37   :  { %203 = vst [vmem:[#allocation9 + $0xe] sm:$0x3] %v195_v47 }
  0x38   :  { %216 = dma.vmem_to_hbm [thread:$0]  %s209_s2, 256, %s211_s30, [#allocation6], %s373_s9, %s373_s9, %s374_s10  }
  0x39   :  { %363 = dma.done.wait [#allocation6], 256  }
  0x3a   :  { %364 = vsyncadd [#allocation6], 4294967040 }
  0x3b   :  { %221 = vsyncpa [#allocation5], 1 }
  0x3c   :  { %222 = vsyncpa [#allocation8], 1 }
  0x3d   :  { %223 = vsyncpa [#allocation6], 1 }

</bundles_post_ra>
